<compile_context>
chip_gen: v7x
topology: tpu7x:2x2x1
jax: 0.10.0
libtpu: 0.0.40
codegen_flags: <defaults>
</compile_context>

<pallas_src>
import functools
import math

import jax
import jax.numpy as jnp
from jax import lax
from jax.experimental import pallas as pl
from jax.experimental.pallas import tpu as pltpu

NUM_BASIS = 8
R_MAX = 1.0

LANE = 128          # TPU lane width (vreg last-axis dim)
MAX_TILE_E = 8192   # max edge-tile width in lanes (per-step VMEM ~0.3 MiB dbl-buffered)


# ---------------------------------------------------------------------------
# Kernel: per-edge spin distance + Bessel basis for one lane-dense edge tile.
#   ab_ref  : [2, TILE_E]  row 0 = rowsum[edge_index[1]] (receiver),
#                          row 1 = rowsum[edge_index[0]] (sender)
#   w_ref   : [B, 1]       bessel_weights / r_max
#   dist_ref: [1, TILE_E]  edge_spin_distance
#   emb_ref : [B, TILE_E]  embedding (lane-dense; wrapper transposes to [E, B])
# ---------------------------------------------------------------------------
def _bessel_kernel(ab_ref, w_ref, dist_ref, emb_ref, *, prefactor):
    ab = ab_ref[...]                                  # [2, TILE_E] f32
    a = ab[0:1, :]                                    # receiver row-sum
    b = ab[1:2, :]                                    # sender row-sum

    # einsum('ki,kj->k', unit[recv], unit[send]) == rowsum[recv] * rowsum[send]
    d = a * b                                         # [1, TILE_E]
    dist_ref[...] = d

    # One full-precision reciprocal per edge (2/r_max folded in).  approx=True
    # would push it fully onto the EUP slot but adds ~1e-3 relative error.
    inv_d = prefactor * pl.reciprocal(d, approx=False)           # [1, TILE_E]

    w = w_ref[...]                                    # [B, 1] = bessel_weights / r_max
    emb_ref[...] = jnp.sin(w * d) * inv_d             # [B,1]*[1,TE] -> [B,TE]


# ---------------------------------------------------------------------------
# Wrapper: tiny O(N)/O(E) prep (node stats + gather) in XLA, Bessel in Pallas.
# ---------------------------------------------------------------------------
def radial_basis_spin_distance_encoding(node_spin, edge_index, bessel_weights, r_max=R_MAX):
    """Returns (node_spin_length [N], edge_spin_distance [E], embedding [E, B])."""
    n_nodes = node_spin.shape[0]
    n_edges = edge_index.shape[1]
    num_basis = bessel_weights.shape[0]

    # ---- node stats + gather in plain XLA (O(N) + O(E) on tiny f32 tensors) ----
    spin = node_spin.astype(jnp.float32)                              # [N, 3]
    sq = jnp.sum(spin * spin, axis=-1)                                # [N]
    length = jnp.sqrt(sq)                                             # ||spin||  [N]
    rowsum = jnp.sum(spin, axis=-1) * lax.rsqrt(sq)                   # sum_i unit_spin[n,i]

    eidx = edge_index.astype(jnp.int32)
    a = rowsum[eidx[1]]                                               # receiver  [E]
    b = rowsum[eidx[0]]                                               # sender    [E]

    # ---- pad the edge axis to a 128-lane-aligned tile multiple -----------------
    tile_e = min(MAX_TILE_E, pl.cdiv(n_edges, LANE) * LANE)
    num_tiles = pl.cdiv(n_edges, tile_e)
    e_pad = num_tiles * tile_e
    # Pad with 1.0 so padded lanes produce d=1 (finite), not inf/NaN.
    ab = jnp.ones((2, e_pad), jnp.float32)
    ab = ab.at[0, :n_edges].set(a).at[1, :n_edges].set(b)

    w_scaled = (bessel_weights.astype(jnp.float32) / r_max).reshape(num_basis, 1)

    kernel = functools.partial(_bessel_kernel, prefactor=2.0 / r_max)

    dist, emb = pl.pallas_call(
        kernel,
        out_shape=(
            jax.ShapeDtypeStruct((1, e_pad), jnp.float32),
            jax.ShapeDtypeStruct((num_basis, e_pad), jnp.float32),
        ),
        grid=(num_tiles,),
        in_specs=[
            pl.BlockSpec((2, tile_e), lambda i: (0, i)),        # gathered rowsums, tiled along E
            pl.BlockSpec((num_basis, 1), lambda i: (0, 0)),     # scaled Bessel weights
        ],
        out_specs=(
            pl.BlockSpec((1, tile_e), lambda i: (0, i)),
            pl.BlockSpec((num_basis, tile_e), lambda i: (0, i)),
        ),
        compiler_params=pltpu.CompilerParams(
            # No output block is revisited across the edge axis -> safe to shard
            # edge tiles across both TensorCores on v7x.
            dimension_semantics=("parallel",),
        ),
    )(ab, w_scaled)

    return length, dist[0, :n_edges], emb[:, :n_edges].T


# ---------------------------------------------------------------------------
# Pure-JAX reference (mirrors the PyTorch forward) for a correctness check.
# ---------------------------------------------------------------------------
def _reference(node_spin, edge_index, bessel_weights, r_max=R_MAX):
    length = jnp.linalg.norm(node_spin, axis=-1)
    unit = node_spin / length[:, None]
    a = unit[edge_index[1]]
    c = unit[edge_index[0]]
    dist = jnp.einsum("ki,kj->k", a, c)
    num = jnp.sin(bessel_weights[None, :] * dist[:, None] / r_max)
    emb = (2.0 / r_max) * (num / dist[:, None])
    return length, dist, emb


if __name__ == "__main__":
    n_nodes = 16
    n_edges = 32

    key = jax.random.PRNGKey(0)
    k_spin, k_send, k_recv = jax.random.split(key, 3)

    # data[NODE_SPIN]: [n_nodes, 3] spin vectors
    node_spin = jax.random.normal(k_spin, (n_nodes, 3), dtype=jnp.float32)
    # data[EDGE_INDEX]: [2, n_edges] (row 0 = sender, row 1 = receiver)
    edge_index = jnp.stack(
        [
            jax.random.randint(k_send, (n_edges,), 0, n_nodes, dtype=jnp.int32),
            jax.random.randint(k_recv, (n_edges,), 0, n_nodes, dtype=jnp.int32),
        ],
        axis=0,
    )
    # Deterministic BesselBasis parameters (trainable init in the PyTorch module).
    bessel_weights = (
        jnp.linspace(1.0, NUM_BASIS, NUM_BASIS, dtype=jnp.float32) * math.pi
    )

    lengths, dist, emb = radial_basis_spin_distance_encoding(
        node_spin, edge_index, bessel_weights
    )
    jax.block_until_ready((lengths, dist, emb))

    ref_len, ref_dist, ref_emb = _reference(node_spin, edge_index, bessel_weights)
    assert jnp.allclose(lengths, ref_len, atol=1e-5, rtol=1e-5)
    assert jnp.allclose(dist, ref_dist, atol=1e-5, rtol=1e-5)
    assert jnp.allclose(emb, ref_emb, atol=1e-4, rtol=1e-4)

    print("KERNEL_OK")
</pallas_src>

<mosaic_0001>
module attributes {stable_mosaic.version = 11 : i64} {
  func.func @_bessel_kernel(%arg0: i32, %arg1: memref<2x128xf32, #tpu.memory_space<vmem>>, %arg2: memref<8x1xf32, #tpu.memory_space<vmem>>, %arg3: memref<1x128xf32, #tpu.memory_space<vmem>>, %arg4: memref<8x128xf32, #tpu.memory_space<vmem>>) attributes {dimension_semantics = [#tpu.dimension_semantics<parallel>], iteration_bounds = array<i64: 1>, scalar_prefetch = 0 : i64, scratch_operands = 0 : i64, tpu.core_type = #tpu.core_type<tc>, window_params = [{transform_indices = @transform_0, window_bounds = array<i64: 2, 128>}, {pipeline_mode = #tpu.pipeline_mode<synchronous>, transform_indices = @transform_1, window_bounds = array<i64: 8, 1>}, {transform_indices = @transform_2, window_bounds = array<i64: 1, 128>}, {transform_indices = @transform_3, window_bounds = array<i64: 8, 128>}]} {
    %c0 = arith.constant 0 : index
    %c0_0 = arith.constant 0 : index
    %0 = vector.load %arg1[%c0, %c0_0] : memref<2x128xf32, #tpu.memory_space<vmem>>, vector<2x128xf32>
    %1 = vector.extract_strided_slice %0 {offsets = [0, 0], sizes = [1, 128], strides = [1, 1]} : vector<2x128xf32> to vector<1x128xf32>
    %2 = vector.extract_strided_slice %0 {offsets = [1, 0], sizes = [1, 128], strides = [1, 1]} : vector<2x128xf32> to vector<1x128xf32>
    %3 = arith.mulf %1, %2 : vector<1x128xf32>
    %c0_1 = arith.constant 0 : index
    %c0_2 = arith.constant 0 : index
    %4 = vector.load %arg3[%c0_1, %c0_2] : memref<1x128xf32, #tpu.memory_space<vmem>>, vector<1x128xf32>
    tpu.vector_store %arg3[%c0_1, %c0_2], %3 {strides = array<i32>} : memref<1x128xf32, #tpu.memory_space<vmem>>, vector<1x128xf32>,
    %5 = tpu.reciprocal %3 : vector<1x128xf32> -> vector<1x128xf32>
    %cst = arith.constant 2.000000e+00 : f32
    %6 = vector.broadcast %cst : f32 to vector<1x128xf32>
    %7 = arith.mulf %6, %5 : vector<1x128xf32>
    %c0_3 = arith.constant 0 : index
    %c0_4 = arith.constant 0 : index
    %8 = vector.load %arg2[%c0_3, %c0_4] : memref<8x1xf32, #tpu.memory_space<vmem>>, vector<8x1xf32>
    %9 = vector.broadcast %8 : vector<8x1xf32> to vector<8x128xf32>
    %10 = vector.broadcast %3 : vector<1x128xf32> to vector<8x128xf32>
    %11 = arith.mulf %9, %10 : vector<8x128xf32>
    %12 = math.sin %11 : vector<8x128xf32>
    %13 = vector.broadcast %7 : vector<1x128xf32> to vector<8x128xf32>
    %14 = arith.mulf %12, %13 : vector<8x128xf32>
    %c0_5 = arith.constant 0 : index
    %c0_6 = arith.constant 0 : index
    %15 = vector.load %arg4[%c0_5, %c0_6] : memref<8x128xf32, #tpu.memory_space<vmem>>, vector<8x128xf32>
    tpu.vector_store %arg4[%c0_5, %c0_6], %14 {strides = array<i32>} : memref<8x128xf32, #tpu.memory_space<vmem>>, vector<8x128xf32>,
    return
  }
  func.func @transform_0(%arg0: i32) -> (i32, i32) {
    %c0_i32 = arith.constant 0 : i32
    %c0_i32_0 = arith.constant 0 : i32
    return %c0_i32, %arg0 : i32, i32
  }
  func.func @transform_1(%arg0: i32) -> (i32, i32) {
    %c0_i32 = arith.constant 0 : i32
    %c0_i32_0 = arith.constant 0 : i32
    %c0_i32_1 = arith.constant 0 : i32
    return %c0_i32, %c0_i32_0 : i32, i32
  }
  func.func @transform_2(%arg0: i32) -> (i32, i32) {
    %c0_i32 = arith.constant 0 : i32
    %c0_i32_0 = arith.constant 0 : i32
    return %c0_i32, %arg0 : i32, i32
  }
  func.func @transform_3(%arg0: i32) -> (i32, i32) {
    %c0_i32 = arith.constant 0 : i32
    %c0_i32_0 = arith.constant 0 : i32
    return %c0_i32, %arg0 : i32, i32
  }
}

</mosaic_0001>

<bundles_post_ra>
// kernel: tpu_custom_call.1
= control target key start
LH: loop header
LB: loop body
LE: loop exit
PB: predicated region body
PF: predicated region fallthrough
CT: control target
= control target key end

     0   :  { %9 = vsyncpa [#allocation3], 0  ;;  %v244_v1 = vmov 0   ;;  %s336_s0 = inlined_call_operand.vmem [shape: f32[2,128], index: 0, kind: input, shape index: {}]   ;;  %s337_s1 = inlined_call_operand.vmem [shape: f32[8,1], index: 1, kind: input, shape index: {}]   ;;  %s338_s2 = inlined_call_operand.hbm [shape: f32[1,128], index: 2, kind: output, shape index: {0}]   ;;  %s339_s3 = inlined_call_operand.hbm [shape: f32[8,128], index: 3, kind: output, shape index: {1}]  }
   0x1   :  { %v23_v0 = vld [vmem:[%s337_s1] sm:$0xff]  ;;  %189 = vset.pattern.permute.xlu0 %v244_v1 }
   0x2   :  { %26 = vperm.xlu0 %189, %v23_v0   ;;  %v15_v2 = vld [vmem:[%s336_s0] sm:$0x3] }
   0x3   :  { %v17_v3 = vrot.slane %v15_v2, 1 }
   0x4   :  { %10 = vsyncpa [#allocation5], 0  ;;  %s245_s16 = smov [#allocation2]  }
   0x5   :  { %v279_v4 = vmul.f32 %v17_v3, %v15_v2  ;;  %s150_s17 = sshll.u32 %s245_s16, 4  ;;  %s151_s17 = int_to_ptr.vmem [resolvable:$true] %s150_s17 }
   0x6   :  { %s196_s18 = scalar_lea.vmem %s151_s17, 16  ;;  %s200_s19 = scalar_lea.vmem %s151_s17, 32 }
   0x7   :  { %20 = vst [vmem:[#allocation2] sm:$0x1] %v279_v4  ;;  %p197_p0 = scmp.ne.s32.totalorder %s151_s17, %s196_s18  ;;  %p201_p1 = scmp.lt.s32.totalorder %s151_s17, %s151_s17 }
   0x8   :  { %p202_p2 = scmp.lt.s32.totalorder %s200_s19, %s196_s18 }
   0xa   :  { %p203_p3 = por %p202_p2, %p201_p1 }
   0xc   :  { %p204_p4 = pnand %p203_p3, %p197_p0 }
   0xe   :  { %207 = shalt.err (!%p204_p4)
}
   0xf   :  { %s208_s0 = scalar_lea.hbm %s338_s2, 16 }
  0x10   :  { %p209_p5 = scmp.ne.s32.totalorder %s338_s2, %s208_s0  ;;  %p212_p6 = scmp.lt.u32.totalorder %s208_s0, %s338_s2 }
  0x12   :  { %p214_p7 = pnand %p212_p6, %p209_p5 }
  0x14   :  { %217 = shalt.err (!%p214_p7)
}
  0x15   :  { %153 = dma.vmem_to_hbm [thread:$0]  %s151_s17, 16, %s338_s2, [#allocation3]   ;;  %v29_v5 = vlaneseq  ;;  %v246_v21 = vmov 683565275   ;;  %v247_v23 = vmov 2475754826   ;;  %190 = vrcp.f32 %v279_v4 }
  0x16   :  { %v248_v26 = vmov 2131351028   ;;  %v249_v29 = vmov 2102212464   ;;  %v250_v32 = vmov 920167782  }
  0x17   :  { %v294_v6 = vshrl.u32 %v29_v5, 7  ;;  %v251_v35 = vmov 1326507024   ;;  %s252_s2 = smov [#allocation4]  }
  0x18   :  { %s160_s27 = sshll.u32 %s252_s2, 4  ;;  %s161_s27 = int_to_ptr.vmem [resolvable:$true] %s160_s27 }
  0x19   :  { %v31_v7 = vsub.s32 0, %v294_v6  ;;  %s218_s28 = scalar_lea.vmem %s161_s27, 128  ;;  %p223_p9 = scmp.lt.s32.totalorder %s161_s27, %s161_s27 }
  0x1a   :  { %p219_p8 = scmp.ne.s32.totalorder %s161_s27, %s218_s28  ;;  %p224_p10 = scmp.lt.s32.totalorder %s218_s28, %s218_s28 }
  0x1b   :  { %v32_v8 = vrot.slane %v279_v4, %v31_v7 }
  0x1c   :  { %p225_p11 = por %p224_p10, %p223_p9 }
  0x1e   :  { %p226_p12 = pnand %p225_p11, %p219_p8 }
  0x81   :  { %v27_v9 = vpop.permute.xlu0 %26 }
  0x82   :  { %v300_v10 = vmul.f32 %v32_v8, %v27_v9 }
  0x84   :  { %v37_v11 = vand.u32 2139095040, %v300_v10  ;;  %v34_v15 = vand.u32 2147483647, %v300_v10  ;;  %vm36_vm7 = vcmp.lt.s32.totalorder %v300_v10, 0  ;;  %vm126_vm12 = vweird.f32 %v300_v10 }
  0x86   :  { %v38_v12 = vshrl.u32 %v37_v11, 23  ;;  %v41_v18 = vand.u32 8388607, %v34_v15  ;;  %vm35_vm8 = vcmp.le.f32.partialorder %v34_v15, 0.7853982 }
  0x88   :  { %v172_v13 = vadd.s32 4294967169, %v38_v12  ;;  %v42_v37 = vor.u32 8388608, %v41_v18 }
  0x8a   :  { %v44_v14 = vadd.s32 1, %v172_v13  ;;  %v82_v51 = vshll.u32 %v42_v37, 8 }
  0x8c   :  { %vm45_vm0 = vcmp.gt.s32.totalorder %v44_v14, 0 }
  0x8d   :  { %v46_v16 = vsel %vm45_vm0, %v44_v14, 0 }
  0x8e   :  { %v48_v17 = vand.u32 31, %v46_v16  ;;  %v47_v20 = vshrl.u32 %v46_v16, 5 }
  0x90   :  { %v49_v19 = vsub.s32 32, %v48_v17  ;;  %v51_v22 = vshll.u32 %v246_v21, %v48_v17  ;;  %v54_v24 = vshll.u32 %v247_v23, %v48_v17  ;;  %v57_v28 = vshll.u32 %v248_v26, %v48_v17 }
  0x91   :  { %v60_v31 = vshll.u32 %v249_v29, %v48_v17  ;;  %v63_v34 = vshll.u32 %v250_v32, %v48_v17  ;;  %vm66_vm1 = vcmp.lt.s32.totalorder %v47_v20, 1  ;;  %vm69_vm2 = vcmp.lt.s32.totalorder %v47_v20, 4 }
  0x92   :  { %v52_v25 = vshrl.u32 %v247_v23, %v49_v19  ;;  %v55_v27 = vshrl.u32 %v248_v26, %v49_v19  ;;  %v58_v30 = vshrl.u32 %v249_v29, %v49_v19  ;;  %v61_v33 = vshrl.u32 %v250_v32, %v49_v19 }
  0x93   :  { %v64_v36 = vshrl.u32 %v251_v35, %v49_v19  ;;  %v50_v46 = vshrl.u32 %v246_v21, %v49_v19  ;;  %vm68_vm3 = vcmp.lt.s32.totalorder %v47_v20, 3  ;;  %vm67_vm4 = vcmp.lt.s32.totalorder %v47_v20, 2 }
  0x94   :  { %v53_v38 = vor.u32 %v52_v25, %v51_v22  ;;  %v56_v39 = vor.u32 %v55_v27, %v54_v24  ;;  %v59_v40 = vor.u32 %v58_v30, %v57_v28  ;;  %v62_v41 = vor.u32 %v61_v33, %v60_v31 }
  0x95   :  { %v65_v42 = vor.u32 %v64_v36, %v63_v34  ;;  %v191_v34 = vpop.eup %190 }
  0x96   :  { %v71_v43 = vsel %vm69_vm2, %v59_v40, 2102212464  ;;  %v74_v44 = vsel %vm66_vm1, %v53_v38, %v56_v39  ;;  %v78_v45 = vsel %vm66_vm1, %v56_v39, %v59_v40  ;;  %v75_v47 = vsel %vm69_vm2, %v62_v41, 920167782 }
  0x97   :  { %v79_v48 = vsel %vm69_vm2, %v65_v42, 1326507024  ;;  %v76_v49 = vsel %vm68_vm3, %v59_v40, %v75_v47  ;;  %v70_v52 = vsel %vm66_vm1, %v50_v46, %v53_v38  ;;  %v72_v53 = vsel %vm68_vm3, %v56_v39, %v71_v43 }
  0x98   :  { %v80_v50 = vsel %vm68_vm3, %v62_v41, %v79_v48  ;;  %v77_v54 = vsel %vm67_vm4, %v74_v44, %v76_v49  ;;  %v73_v60 = vsel %vm67_vm4, %v70_v52, %v72_v53  ;;  %v22_v36 = vmul.f32 2.0, %v191_v34 }
  0x99   :  { %v81_v55 = vsel %vm67_vm4, %v78_v45, %v80_v50  ;;  %v309_v58 = vmul.u32.u64.low %v82_v51, %v77_v54  ;;  %v310_v59 = vmul.u32.u64.high %v82_v51, %v77_v54, %v309_v58  ;;  %v89_v62 = vmul.u32 %v82_v51, %v73_v60 }
  0x9a   :  { %v306_v56 = vmul.u32.u64.low %v82_v51, %v81_v55  ;;  %v307_v57 = vmul.u32.u64.high %v82_v51, %v81_v55, %v306_v56  ;;  %v141_v15 = vrot.slane %v22_v36, %v31_v7 }
  0x9b   :  { %v92_v61 = vadd.s32 1, %v310_v59 }
  0x9c   :  { %vm91_vm5 = vc.u32 %v307_v57, %v309_v58  ;;  %v90_v14 = vadd.s32 %v309_v58, %v307_v57 }
  0x9d   :  { %v93_v63 = vsel %vm91_vm5, %v92_v61, %v310_v59 }
  0x9e   :  { %v94_v0 = vadd.s32 %v93_v63, %v89_v62 }
  0xa0   :  { %v95_v1 = vadd.s32 536870912, %v94_v0 }
  0xa2   :  { %v96_v2 = vshrl.u32 %v95_v1, 30 }
  0xa4   :  { %v97_v3 = vshll.u32 %v96_v2, 30  ;;  %v120_v27 = vsub.s32 4, %v96_v2 }
  0xa6   :  { %v98_v5 = vsub.s32 %v94_v0, %v97_v3  ;;  %v121_v30 = vsel %vm36_vm7, %v120_v27, %v96_v2 }
  0xa7   :  { %v123_v32 = vsel %vm35_vm8, 0, %v121_v30 }
  0xa8   :  { %v100_v8 = vsub.s32 0, %v98_v5  ;;  %v127_v33 = vadd.s32 3, %v123_v32 }
  0xaa   :  { %v173_v9 = vmin.u32 %v100_v8, %v98_v5  ;;  %v128_v35 = vand.u32 3, %v127_v33 }
  0xac   :  { %v102_v11 = vclz %v173_v9  ;;  %vm133_vm9 = vcmp.eq.s32.totalorder %v128_v35, 2  ;;  %vm130_vm10 = vcmp.eq.s32.totalorder %v128_v35, 0  ;;  %vm129_vm11 = vcmp.lt.s32.totalorder %v128_v35, 2 }
  0xae   :  { %v174_v12 = vadd.s32 4294967294, %v102_v11 }
  0xb0   :  { %vm175_vm6 = vcmp.lt.s32.totalorder %v174_v12, 0 }
  0xb1   :  { %v105_v13 = vsel %vm175_vm6, 0, %v174_v12 }
  0xb2   :  { %v106_v16 = vsub.s32 32, %v105_v13  ;;  %v110_v17 = vsub.s32 4294967266, %v105_v13  ;;  %v107_v18 = vshll.u32 %v98_v5, %v105_v13 }
  0xb4   :  { %v108_v19 = vshrl.u32 %v90_v14, %v106_v16  ;;  %v111_v20 = vadd.s32 127, %v110_v17 }
  0xb6   :  { %v109_v21 = vor.u32 %v108_v19, %v107_v18  ;;  %v112_v22 = vshll.u32 %v111_v20, 23 }
  0xb8   :  { %v113_v23 = vor.u32 4788187, %v112_v22  ;;  %v116_v25 = vcvt.s32.f32 %v109_v21 }
  0xba   :  { %v114_v24 = vand.u32 2147483647, %v113_v23 }
  0xbc   :  { %v117_v26 = vmul.f32 %v116_v25, %v114_v24 }
  0xbe   :  { %v118_v28 = vxor.u32 2147483648, %v117_v26 }
  0xc0   :  { %v119_v29 = vsel %vm36_vm7, %v118_v28, %v117_v26 }
  0xc1   :  { %v122_v31 = vsel %vm35_vm8, %v300_v10, %v119_v29 }
  0xc2   :  { %192 = vcosq.f32 %v122_v31 }
  0xc3   :  { %194 = vsinq.f32 %v122_v31 }
  0xcc   :  { %v193_v37 = vpop.eup %192 }
  0xcd   :  { %v195_v38 = vpop.eup %194  ;;  %v134_v39 = vxor.u32 2147483648, %v193_v37 }
  0xce   :  { %v131_v4 = vxor.u32 2147483648, %v195_v38 }
  0xcf   :  { %v135_v40 = vsel %vm133_vm9, %v134_v39, %v195_v38 }
  0xd0   :  { %v132_v41 = vsel %vm130_vm10, %v193_v37, %v131_v4 }
  0xd1   :  { %v136_v42 = vsel %vm129_vm11, %v132_v41, %v135_v40 }
  0xd2   :  { %v137_v43 = vsel %vm126_vm12, nan, %v136_v42 }
  0xd3   :  { %v142_v44 = vmul.f32 %v141_v15, %v137_v43 }
  0xd5   :  { %143 = vst [vmem:[#allocation4] sm:$0xff] %v142_v44 }
  0xd6   :  { %229 = shalt.err (!%p226_p12)
}
  0xd7   :  { %s230_s4 = scalar_lea.hbm %s339_s3, 128 }
  0xd8   :  { %p231_p13 = scmp.ne.s32.totalorder %s339_s3, %s230_s4  ;;  %p234_p0 = scmp.lt.u32.totalorder %s230_s4, %s339_s3 }
  0xda   :  { %p236_p1 = pnand %p234_p0, %p231_p13 }
  0xdc   :  { %239 = shalt.err (!%p236_p1)
}
  0xdd   :  { %163 = dma.vmem_to_hbm [thread:$0]  %s161_s27, 128, %s339_s3, [#allocation5]  }
  0xde   :  { %240 = dma.done.wait [#allocation3], 16  }
  0xdf   :  { %241 = vsyncadd [#allocation3], 4294967280 }
  0xe0   :  { %242 = dma.done.wait [#allocation5], 128  }
  0xe1   :  { %243 = vsyncadd [#allocation5], 4294967168 }
  0xe2   :  { %170 = vsyncpa [#allocation3], 1 }
  0xe3   :  { %171 = vsyncpa [#allocation5], 1 }

</bundles_post_ra>
